<compile_context>
chip_gen: v5e
topology: v5e:2x2
jax: 0.10.0
libtpu: 0.0.40
codegen_flags: <defaults>
</compile_context>

<pallas_src>
import functools

import jax
import jax.numpy as jnp
import numpy as np
from jax.experimental import pallas as pl
from jax.experimental.pallas import tpu as pltpu


def _unfold_canonical_kernel(x_ref, o_ref, *, p_size, stri, nW, C, G):
    # x_ref: (1, C, Hp, Wp)       one padded image, resident across the b axis.
    # o_ref: (1, G*nW*C, p, p)    G consecutive patch-rows, already in the
    #                             canonical torch (ly, lx, c, ky, kx) order, so
    #                             no wrapper-side reorder pass is needed.
    b = pl.program_id(1)
    for j in range(G):                                   # static unrolled loop
        row = pl.multiple_of((b * G + j) * stri, stri)   # dynamic sublane start
        for lx in range(nW):                             # static lane offsets
            # One (C, p, p) chunk per store: bounds live vregs (item #6).
            chunk = x_ref[0, :, pl.ds(row, p_size), lx * stri: lx * stri + p_size]
            base = (j * nW + lx) * C
            o_ref[0, base: base + C] = chunk


def _round_up(v, m):
    return -(-v // m) * m


@functools.partial(jax.jit, static_argnames=("p_size", "stri", "pad"))
def _unfold_pallas(x, *, p_size, stri, pad):
    """nn.Unfold + permute(0,2,1) + view(1, -1, p, p) for NCHW input."""
    N, C, H, W = x.shape
    if pad > 0:
        # TODO(synk): fold the zero padding into the kernel (clamped band reads
        # + masked edge writes) to drop this extra full read+write pass over x.
        x = jnp.pad(x, ((0, 0), (0, 0), (pad, pad), (pad, pad)))
    Hp, Wp = H + 2 * pad, W + 2 * pad
    nH = (Hp - p_size) // stri + 1
    nW = (Wp - p_size) // stri + 1
    L = nH * nW
    itemsize = x.dtype.itemsize

    # ---- VMEM arithmetic (items #3 / #4 / #5) ------------------------------
    # Input block (whole padded image) and per-band output block sizes, using
    # the physical (8, 128) VMEM tiling of the minor two dims.
    in_block_vmem = C * _round_up(Hp, 8) * _round_up(Wp, 128) * itemsize
    band_out_vmem = nW * C * _round_up(p_size, 8) * _round_up(p_size, 128) * itemsize

    # Pick G = patch-rows per grid step: largest divisor of nH such that the
    # double-buffered blocks fit the budget and, if possible, the grid still
    # has >= 2 parallel work units (so v7x's 2 TensorCores both get work).
    budget = 24 << 20
    G = 1
    for cand in sorted((d for d in range(1, nH + 1) if nH % d == 0), reverse=True):
        fits = 2 * in_block_vmem + 2 * cand * band_out_vmem <= budget
        enough_parallel = (N * (nH // cand) >= 2) or (N * nH < 2)
        if fits and enough_parallel:
            G = cand
            break
    BpI = nH // G  # output blocks per image along dim 1

    vmem_limit = int(min(max(2 * in_block_vmem + 2 * G * band_out_vmem + (8 << 20),
                             32 << 20),
                         64 << 20))

    kernel = functools.partial(_unfold_canonical_kernel,
                               p_size=p_size, stri=stri, nW=nW, C=C, G=G)

    # Grid: (N, BpI) with b innermost.  The input block index only depends on
    # n, so the image stays resident across all b steps (no re-fetch).  Do NOT
    # reorder these axes: putting n innermost would re-DMA the image per band.
    return pl.pallas_call(
        kernel,
        out_shape=jax.ShapeDtypeStruct((1, N * L * C, p_size, p_size), x.dtype),
        grid=(N, BpI),
        in_specs=[pl.BlockSpec((1, C, Hp, Wp), lambda n, b: (n, 0, 0, 0))],
        out_specs=pl.BlockSpec((1, G * nW * C, p_size, p_size),
                               lambda n, b, BpI=BpI: (0, n * BpI + b, 0, 0)),
        compiler_params=pltpu.CompilerParams(
            dimension_semantics=("parallel", "parallel"),
            vmem_limit_bytes=vmem_limit),
    )(x)


class MyTensorSplit:
    """JAX/Pallas port of the PyTorch `mytensorsplit` module."""

    def __init__(self, p_size=8, stri=4, pad=0, index=False, H=16, W=16):
        self.H = H
        self.W = W
        self.index = index
        self.kernel_size = p_size
        self.stri = stri
        self.pad = pad
        self._unfold = functools.partial(
            _unfold_pallas, p_size=p_size, stri=stri, pad=pad)
        if index:
            # Coordinate maps are constants of (H, W, p, stri, pad): unfold
            # them once at construction time instead of every forward call.
            ymap, xmap = np.mgrid[0:H:1, 0:W:1]
            Ymap = jnp.asarray(ymap, dtype=jnp.float32)[None, None]   # (1,1,H,W)
            Xmap = jnp.asarray(xmap, dtype=jnp.float32)[None, None]   # (1,1,H,W)
            self.ind_y = self._unfold(Ymap)[0]    # (L, p, p)
            self.ind_x = self._unfold(Xmap)[0]    # (L, p, p)
        else:
            self.ind_y = None
            self.ind_x = None

    def __call__(self, x):
        if self.index:
            xo = self._unfold(x)                  # (1, N*L*C, p, p)
            return xo[0], self.ind_y, self.ind_x  # torch: .squeeze(0)
        else:
            return self._unfold(x)                # (1, N*L*C, p, p)


def _unfold_ref(x, p, s, pad):
    """Pure-JAX reference reproducing torch unfold+permute+view semantics."""
    N, C, H, W = x.shape
    xp = jnp.pad(x, ((0, 0), (0, 0), (pad, pad), (pad, pad)))
    nH = (H + 2 * pad - p) // s + 1
    nW = (W + 2 * pad - p) // s + 1
    patches = []
    for n in range(N):
        for ly in range(nH):
            for lx in range(nW):
                for c in range(C):
                    patches.append(
                        xp[n, c, ly * s:ly * s + p, lx * s:lx * s + p])
    return jnp.stack(patches)[None]  # (1, N*L*C, p, p)


if __name__ == "__main__":
    # Small shapes consistent with the module's forward.
    N, C, H, W = 2, 4, 16, 16
    p_size, stri, pad = 8, 4, 0

    key = jax.random.PRNGKey(0)
    x = jax.random.normal(key, (N, C, H, W), dtype=jnp.float32)

    nH = (H + 2 * pad - p_size) // stri + 1
    nW = (W + 2 * pad - p_size) // stri + 1
    L = nH * nW

    # Default path (index=False), coarsened grid (one step per image here).
    mod = MyTensorSplit(p_size=p_size, stri=stri, pad=pad, index=False, H=H, W=W)
    out = jax.block_until_ready(mod(x))
    ref = _unfold_ref(x, p_size, stri, pad)
    assert out.shape == ref.shape, (out.shape, ref.shape)
    np.testing.assert_allclose(np.asarray(out), np.asarray(ref), rtol=0, atol=0)

    # index=True path (N=1, C=1 maps; exercises the per-band grid, G=1).
    mod_idx = MyTensorSplit(p_size=p_size, stri=stri, pad=pad, index=True, H=H, W=W)
    xo, iy, ixm = mod_idx(x)
    jax.block_until_ready((xo, iy, ixm))
    assert xo.shape == (N * L * C, p_size, p_size), xo.shape
    assert iy.shape == (L, p_size, p_size) and ixm.shape == (L, p_size, p_size)
    np.testing.assert_allclose(np.asarray(xo), np.asarray(ref[0]), rtol=0, atol=0)

    ymap, xmap = np.mgrid[0:H:1, 0:W:1]
    ref_y = _unfold_ref(jnp.asarray(ymap, jnp.float32)[None, None], p_size, stri, pad)
    ref_x = _unfold_ref(jnp.asarray(xmap, jnp.float32)[None, None], p_size, stri, pad)
    np.testing.assert_allclose(np.asarray(iy), np.asarray(ref_y[0]), rtol=0, atol=0)
    np.testing.assert_allclose(np.asarray(ixm), np.asarray(ref_x[0]), rtol=0, atol=0)

    # pad > 0 path.
    mod_pad = MyTensorSplit(p_size=p_size, stri=stri, pad=1, index=False, H=H, W=W)
    out_pad = jax.block_until_ready(mod_pad(x))
    ref_pad = _unfold_ref(x, p_size, stri, 1)
    assert out_pad.shape == ref_pad.shape, (out_pad.shape, ref_pad.shape)
    np.testing.assert_allclose(np.asarray(out_pad), np.asarray(ref_pad), rtol=0, atol=0)

    print("KERNEL_OK")
</pallas_src>

<mosaic_0001>
module attributes {stable_mosaic.version = 11 : i64} {
  func.func @_unfold_canonical_kernel(%arg0: i32, %arg1: i32, %arg2: memref<1x4x16x16xf32, #tpu.memory_space<vmem>>, %arg3: memref<1x36x8x8xf32, #tpu.memory_space<vmem>>) attributes {dimension_semantics = [#tpu.dimension_semantics<parallel>, #tpu.dimension_semantics<parallel>], iteration_bounds = array<i64: 2, 1>, scalar_prefetch = 0 : i64, scratch_operands = 0 : i64, tpu.core_type = #tpu.core_type<tc>, window_params = [{transform_indices = @transform_0, window_bounds = array<i64: 1, 4, 16, 16>}, {transform_indices = @transform_1, window_bounds = array<i64: 1, 36, 8, 8>}]} {
    %c3_i32 = arith.constant 3 : i32
    %0 = arith.muli %arg1, %c3_i32 : i32
    %c0_i32 = arith.constant 0 : i32
    %1 = arith.addi %0, %c0_i32 : i32
    %c4_i32 = arith.constant 4 : i32
    %2 = arith.muli %1, %c4_i32 : i32
    %3 = tpu.assume_multiple %2, 4 : i32
    %c0 = arith.constant 0 : index
    %c0_0 = arith.constant 0 : index
    %4 = arith.index_cast %3 : i32 to index
    %c0_1 = arith.constant 0 : index
    %5 = vector.load %arg2[%c0, %c0_0, %4, %c0_1] : memref<1x4x16x16xf32, #tpu.memory_space<vmem>>, vector<1x4x8x8xf32>
    %6 = vector.shape_cast %5 : vector<1x4x8x8xf32> to vector<4x8x8xf32>
    %c0_2 = arith.constant 0 : index
    %c0_3 = arith.constant 0 : index
    %c0_4 = arith.constant 0 : index
    %c0_5 = arith.constant 0 : index
    %7 = vector.load %arg3[%c0_2, %c0_3, %c0_4, %c0_5] : memref<1x36x8x8xf32, #tpu.memory_space<vmem>>, vector<1x4x8x8xf32>
    %8 = vector.shape_cast %7 : vector<1x4x8x8xf32> to vector<4x8x8xf32>
    %9 = vector.shape_cast %6 : vector<4x8x8xf32> to vector<1x4x8x8xf32>
    tpu.vector_store %arg3[%c0_2, %c0_3, %c0_4, %c0_5], %9 {strides = array<i32>} : memref<1x36x8x8xf32, #tpu.memory_space<vmem>>, vector<1x4x8x8xf32>,
    %c0_6 = arith.constant 0 : index
    %c0_7 = arith.constant 0 : index
    %10 = arith.index_cast %3 : i32 to index
    %c4 = arith.constant 4 : index
    %11 = vector.load %arg2[%c0_6, %c0_7, %10, %c4] : memref<1x4x16x16xf32, #tpu.memory_space<vmem>>, vector<1x4x8x8xf32>
    %12 = vector.shape_cast %11 : vector<1x4x8x8xf32> to vector<4x8x8xf32>
    %c0_8 = arith.constant 0 : index
    %c4_9 = arith.constant 4 : index
    %c0_10 = arith.constant 0 : index
    %c0_11 = arith.constant 0 : index
    %13 = vector.load %arg3[%c0_8, %c4_9, %c0_10, %c0_11] : memref<1x36x8x8xf32, #tpu.memory_space<vmem>>, vector<1x4x8x8xf32>
    %14 = vector.shape_cast %13 : vector<1x4x8x8xf32> to vector<4x8x8xf32>
    %15 = vector.shape_cast %12 : vector<4x8x8xf32> to vector<1x4x8x8xf32>
    tpu.vector_store %arg3[%c0_8, %c4_9, %c0_10, %c0_11], %15 {strides = array<i32>} : memref<1x36x8x8xf32, #tpu.memory_space<vmem>>, vector<1x4x8x8xf32>,
    %c0_12 = arith.constant 0 : index
    %c0_13 = arith.constant 0 : index
    %16 = arith.index_cast %3 : i32 to index
    %c8 = arith.constant 8 : index
    %17 = vector.load %arg2[%c0_12, %c0_13, %16, %c8] : memref<1x4x16x16xf32, #tpu.memory_space<vmem>>, vector<1x4x8x8xf32>
    %18 = vector.shape_cast %17 : vector<1x4x8x8xf32> to vector<4x8x8xf32>
    %c0_14 = arith.constant 0 : index
    %c8_15 = arith.constant 8 : index
    %c0_16 = arith.constant 0 : index
    %c0_17 = arith.constant 0 : index
    %19 = vector.load %arg3[%c0_14, %c8_15, %c0_16, %c0_17] : memref<1x36x8x8xf32, #tpu.memory_space<vmem>>, vector<1x4x8x8xf32>
    %20 = vector.shape_cast %19 : vector<1x4x8x8xf32> to vector<4x8x8xf32>
    %21 = vector.shape_cast %18 : vector<4x8x8xf32> to vector<1x4x8x8xf32>
    tpu.vector_store %arg3[%c0_14, %c8_15, %c0_16, %c0_17], %21 {strides = array<i32>} : memref<1x36x8x8xf32, #tpu.memory_space<vmem>>, vector<1x4x8x8xf32>,
    %c3_i32_18 = arith.constant 3 : i32
    %22 = arith.muli %arg1, %c3_i32_18 : i32
    %c1_i32 = arith.constant 1 : i32
    %23 = arith.addi %22, %c1_i32 : i32
    %c4_i32_19 = arith.constant 4 : i32
    %24 = arith.muli %23, %c4_i32_19 : i32
    %25 = tpu.assume_multiple %24, 4 : i32
    %c0_20 = arith.constant 0 : index
    %c0_21 = arith.constant 0 : index
    %26 = arith.index_cast %25 : i32 to index
    %c0_22 = arith.constant 0 : index
    %27 = vector.load %arg2[%c0_20, %c0_21, %26, %c0_22] : memref<1x4x16x16xf32, #tpu.memory_space<vmem>>, vector<1x4x8x8xf32>
    %28 = vector.shape_cast %27 : vector<1x4x8x8xf32> to vector<4x8x8xf32>
    %c0_23 = arith.constant 0 : index
    %c12 = arith.constant 12 : index
    %c0_24 = arith.constant 0 : index
    %c0_25 = arith.constant 0 : index
    %29 = vector.load %arg3[%c0_23, %c12, %c0_24, %c0_25] : memref<1x36x8x8xf32, #tpu.memory_space<vmem>>, vector<1x4x8x8xf32>
    %30 = vector.shape_cast %29 : vector<1x4x8x8xf32> to vector<4x8x8xf32>
    %31 = vector.shape_cast %28 : vector<4x8x8xf32> to vector<1x4x8x8xf32>
    tpu.vector_store %arg3[%c0_23, %c12, %c0_24, %c0_25], %31 {strides = array<i32>} : memref<1x36x8x8xf32, #tpu.memory_space<vmem>>, vector<1x4x8x8xf32>,
    %c0_26 = arith.constant 0 : index
    %c0_27 = arith.constant 0 : index
    %32 = arith.index_cast %25 : i32 to index
    %c4_28 = arith.constant 4 : index
    %33 = vector.load %arg2[%c0_26, %c0_27, %32, %c4_28] : memref<1x4x16x16xf32, #tpu.memory_space<vmem>>, vector<1x4x8x8xf32>
    %34 = vector.shape_cast %33 : vector<1x4x8x8xf32> to vector<4x8x8xf32>
    %c0_29 = arith.constant 0 : index
    %c16 = arith.constant 16 : index
    %c0_30 = arith.constant 0 : index
    %c0_31 = arith.constant 0 : index
    %35 = vector.load %arg3[%c0_29, %c16, %c0_30, %c0_31] : memref<1x36x8x8xf32, #tpu.memory_space<vmem>>, vector<1x4x8x8xf32>
    %36 = vector.shape_cast %35 : vector<1x4x8x8xf32> to vector<4x8x8xf32>
    %37 = vector.shape_cast %34 : vector<4x8x8xf32> to vector<1x4x8x8xf32>
    tpu.vector_store %arg3[%c0_29, %c16, %c0_30, %c0_31], %37 {strides = array<i32>} : memref<1x36x8x8xf32, #tpu.memory_space<vmem>>, vector<1x4x8x8xf32>,
    %c0_32 = arith.constant 0 : index
    %c0_33 = arith.constant 0 : index
    %38 = arith.index_cast %25 : i32 to index
    %c8_34 = arith.constant 8 : index
    %39 = vector.load %arg2[%c0_32, %c0_33, %38, %c8_34] : memref<1x4x16x16xf32, #tpu.memory_space<vmem>>, vector<1x4x8x8xf32>
    %40 = vector.shape_cast %39 : vector<1x4x8x8xf32> to vector<4x8x8xf32>
    %c0_35 = arith.constant 0 : index
    %c20 = arith.constant 20 : index
    %c0_36 = arith.constant 0 : index
    %c0_37 = arith.constant 0 : index
    %41 = vector.load %arg3[%c0_35, %c20, %c0_36, %c0_37] : memref<1x36x8x8xf32, #tpu.memory_space<vmem>>, vector<1x4x8x8xf32>
    %42 = vector.shape_cast %41 : vector<1x4x8x8xf32> to vector<4x8x8xf32>
    %43 = vector.shape_cast %40 : vector<4x8x8xf32> to vector<1x4x8x8xf32>
    tpu.vector_store %arg3[%c0_35, %c20, %c0_36, %c0_37], %43 {strides = array<i32>} : memref<1x36x8x8xf32, #tpu.memory_space<vmem>>, vector<1x4x8x8xf32>,
    %c3_i32_38 = arith.constant 3 : i32
    %44 = arith.muli %arg1, %c3_i32_38 : i32
    %c2_i32 = arith.constant 2 : i32
    %45 = arith.addi %44, %c2_i32 : i32
    %c4_i32_39 = arith.constant 4 : i32
    %46 = arith.muli %45, %c4_i32_39 : i32
    %47 = tpu.assume_multiple %46, 4 : i32
    %c0_40 = arith.constant 0 : index
    %c0_41 = arith.constant 0 : index
    %48 = arith.index_cast %47 : i32 to index
    %c0_42 = arith.constant 0 : index
    %49 = vector.load %arg2[%c0_40, %c0_41, %48, %c0_42] : memref<1x4x16x16xf32, #tpu.memory_space<vmem>>, vector<1x4x8x8xf32>
    %50 = vector.shape_cast %49 : vector<1x4x8x8xf32> to vector<4x8x8xf32>
    %c0_43 = arith.constant 0 : index
    %c24 = arith.constant 24 : index
    %c0_44 = arith.constant 0 : index
    %c0_45 = arith.constant 0 : index
    %51 = vector.load %arg3[%c0_43, %c24, %c0_44, %c0_45] : memref<1x36x8x8xf32, #tpu.memory_space<vmem>>, vector<1x4x8x8xf32>
    %52 = vector.shape_cast %51 : vector<1x4x8x8xf32> to vector<4x8x8xf32>
    %53 = vector.shape_cast %50 : vector<4x8x8xf32> to vector<1x4x8x8xf32>
    tpu.vector_store %arg3[%c0_43, %c24, %c0_44, %c0_45], %53 {strides = array<i32>} : memref<1x36x8x8xf32, #tpu.memory_space<vmem>>, vector<1x4x8x8xf32>,
    %c0_46 = arith.constant 0 : index
    %c0_47 = arith.constant 0 : index
    %54 = arith.index_cast %47 : i32 to index
    %c4_48 = arith.constant 4 : index
    %55 = vector.load %arg2[%c0_46, %c0_47, %54, %c4_48] : memref<1x4x16x16xf32, #tpu.memory_space<vmem>>, vector<1x4x8x8xf32>
    %56 = vector.shape_cast %55 : vector<1x4x8x8xf32> to vector<4x8x8xf32>
    %c0_49 = arith.constant 0 : index
    %c28 = arith.constant 28 : index
    %c0_50 = arith.constant 0 : index
    %c0_51 = arith.constant 0 : index
    %57 = vector.load %arg3[%c0_49, %c28, %c0_50, %c0_51] : memref<1x36x8x8xf32, #tpu.memory_space<vmem>>, vector<1x4x8x8xf32>
    %58 = vector.shape_cast %57 : vector<1x4x8x8xf32> to vector<4x8x8xf32>
    %59 = vector.shape_cast %56 : vector<4x8x8xf32> to vector<1x4x8x8xf32>
    tpu.vector_store %arg3[%c0_49, %c28, %c0_50, %c0_51], %59 {strides = array<i32>} : memref<1x36x8x8xf32, #tpu.memory_space<vmem>>, vector<1x4x8x8xf32>,
    %c0_52 = arith.constant 0 : index
    %c0_53 = arith.constant 0 : index
    %60 = arith.index_cast %47 : i32 to index
    %c8_54 = arith.constant 8 : index
    %61 = vector.load %arg2[%c0_52, %c0_53, %60, %c8_54] : memref<1x4x16x16xf32, #tpu.memory_space<vmem>>, vector<1x4x8x8xf32>
    %62 = vector.shape_cast %61 : vector<1x4x8x8xf32> to vector<4x8x8xf32>
    %c0_55 = arith.constant 0 : index
    %c32 = arith.constant 32 : index
    %c0_56 = arith.constant 0 : index
    %c0_57 = arith.constant 0 : index
    %63 = vector.load %arg3[%c0_55, %c32, %c0_56, %c0_57] : memref<1x36x8x8xf32, #tpu.memory_space<vmem>>, vector<1x4x8x8xf32>
    %64 = vector.shape_cast %63 : vector<1x4x8x8xf32> to vector<4x8x8xf32>
    %65 = vector.shape_cast %62 : vector<4x8x8xf32> to vector<1x4x8x8xf32>
    tpu.vector_store %arg3[%c0_55, %c32, %c0_56, %c0_57], %65 {strides = array<i32>} : memref<1x36x8x8xf32, #tpu.memory_space<vmem>>, vector<1x4x8x8xf32>,
    return
  }
  func.func @transform_0(%arg0: i32, %arg1: i32) -> (i32, i32, i32, i32) {
    %c0_i32 = arith.constant 0 : i32
    %c0_i32_0 = arith.constant 0 : i32
    %c0_i32_1 = arith.constant 0 : i32
    %c0_i32_2 = arith.constant 0 : i32
    return %arg0, %c0_i32, %c0_i32_0, %c0_i32_1 : i32, i32, i32, i32
  }
  func.func @transform_1(%arg0: i32, %arg1: i32) -> (i32, i32, i32, i32) {
    %c1_i32 = arith.constant 1 : i32
    %0 = arith.muli %arg0, %c1_i32 : i32
    %1 = arith.addi %0, %arg1 : i32
    %c0_i32 = arith.constant 0 : i32
    %c0_i32_0 = arith.constant 0 : i32
    %c0_i32_1 = arith.constant 0 : i32
    %c0_i32_2 = arith.constant 0 : i32
    return %c0_i32, %1, %c0_i32_0, %c0_i32_1 : i32, i32, i32, i32
  }
}

</mosaic_0001>

<bundles_post_ra>
// kernel: _unfold_pallas.1
= control target key start
LH: loop header
LB: loop body
LE: loop exit
PB: predicated region body
PF: predicated region fallthrough
CT: control target
= control target key end

     0   :  { %6 = vsyncpa [#allocation3], 0  ;;  %s855_s0 = inlined_call_operand.hbm [shape: f32[2,4,16,16], index: 0, kind: input, shape index: {}]   ;;  %s856_s1 = inlined_call_operand.vmem [shape: f32[1,72,8,8], index: 1, kind: output, shape index: {}]  }
   0x1   :  { %8 = vsyncpa [#allocation3 + $0x1], 0  ;;  %s656_s6 = smov 0   ;;  %s658_s7 = smov 0  }
   0x2   :  { %s660_s8 = smov 0   ;;  %s662_s9 = smov 0  }
   0x3   :  { %s664_s10 = smov 0   ;;  %s666_s11 = smov 0  }
   0x4 LB: > { %s432_s12 = sadd.s32 4294967295, %s640_s11   ;;  %s26_s13 = sadd.s32 1, %s636_s10  ;;  %s640_s11 = sphi %s666_s11, %s14_s11   ;;  %s636_s10 = sphi %s664_s10, %s863_s10   ;;  %s632_s9 = sphi %s662_s9, %s862_s9   ;;  %s628_s8 = sphi %s660_s8, %s861_s8   ;;  %s624_s7 = sphi %s658_s7, %s860_s7   ;;  %s620_s6 = sphi %s656_s6, %s859_s6  }
   0x5   : > { %p28_p0 = scmp.ge.s32.totalorder %s26_s13, 2  ;;  %s33_s14 = sadd.s32 1, %s628_s8 }
   0x6   : > { %p40_p1 = scmp.ne.s32.totalorder %s628_s8, %s624_s7  ;;  %p41_p2 = scmp.eq.s32.totalorder %s640_s11, 0 }
   0x7   : > { %s865_s13 = smov (%p28_p0, %s26_s13), 0  ;;  %p46_p4 = scmp.ne.s32.totalorder %s624_s7, %s620_s6 }
   0x8   : > { %p692_p3 = por %p41_p2, %p40_p1  ;;  %s30_s16 = ssub.s32 %s636_s10, %s865_s13 }
   0x9   : > { %p47_p5 = scmp.eq.s32.totalorder %s432_s12, 0  ;;  %p31_p6 = scmp.eq.s32.totalorder %s30_s16, 0 }
   0xa   : > { %p507_p8 = scmp.lt.s32.totalorder %s640_s11, 2  ;;  %s98_s19 = sand.u32 1, %s628_s8  }
   0xb   : > { %p699_p7 = por %p47_p5, %p46_p4  ;;  %s500_s20 = sshll.u32 %s636_s10, 6 }
   0xc   : > { %s705_s18 = scalar_select %p31_p6, %s628_s8, %s33_s14  }
   0xd   : > { %s436_s21 = sshll.u32 %s98_s19, 6  ;;  %s107_s24 = scalar_lea.hbm %s855_s0, %s500_s20 }
   0xe   : > { %s108_s25 = sshll.u32 %s107_s24, 4  ;;  %s102_s26 = scalar_lea.vmem [#allocation2], %s436_s21  ;;  %s109_s25 = int_to_ptr.hbm [resolvable:$true] %s108_s25 }
   0xf   : > { %s110_s27 = sshll.u32 %s102_s26, 4  ;;  %p504_p9 = pnand %p507_p8, %p692_p3  ;;  %s111_s27 = int_to_ptr.vmem [resolvable:$true] %s110_s27 }
  0x10   : > { %p439_p10 = scmp.ge.s32.totalorder %s640_s11, 1  ;;  %p118_p11 = scmp.lt.s32.totalorder %s640_s11, 3 }
  0x11   : > { %s99_s28 = scalar_lea.sflag [#allocation3], %s98_s19  ;;  %s642_s29 = smov 128  }
  0x12   : > { %s643_s30 = smov 8   ;;  %p119_p12 = pnand %p439_p10, %p118_p11 }
  0x13   : > { %506 = dma.hbm_to_vmem [thread:$0]  (!%p504_p9), %s109_s25, 1024, %s111_s27, %s99_s28, %s642_s29, %s642_s29, %s643_s30  }
  0x14   : > { %122 = sbr.rel (%p119_p12) target bundleno = 200 (0xc8), region = 24  ;;  %s124_s2 = sand.u32 (!%p119_p12), 1, %s624_s7  }
  0x15   : > { %s440_s3 = sshll.u32 (!%p119_p12), %s124_s2, 6  ;;  %s125_s4 = scalar_lea.sflag (!%p119_p12), [#allocation3], %s124_s2 }
  0x16   : > { %s717_s5 = scalar_lea.vmem (!%p119_p12), [#allocation2], %s440_s3 }
  0x19   : > { %615 = dma.done.wait (%p699_p7), %s125_s4, 1024  }
  0x1a   : > { %617 = vsyncadd (%p699_p7), %s125_s4, 4294966272  ;;  %v170_v0 = vld [vmem:[%s717_s5 + $0x20] sm:$0xff]  ;;  %s644_s6 = smov 124   ;;  %s645_s12 = smov 120   ;;  %v171_v2 = vld [vmem:[%s717_s5 + $0x30] sm:$0xff]  ;;  %vm163_vm0 = vcmask 64512  }
  0x1b   : > { %v168_v1 = vld [vmem:[%s717_s5] sm:$0xff]  ;;  %180 = vrot.lane.b32.xlu1 %v170_v0, %s644_s6  ;;  %v169_v3 = vld [vmem:[%s717_s5 + $0x10] sm:$0xff]  ;;  %s150_s14 = smul.u32 36, %s632_s9  ;;  %v482_v8 = vld [vmem:[%s717_s5 + $0x8] sm:$0xff] }
  0x1c   : > { %176 = vrot.lane.b32.xlu0 %v168_v1, %s644_s6  ;;  %201 = vrot.lane.b32.xlu2 %v168_v1, %s645_s12  ;;  %v466_v4 = vld [vmem:[%s717_s5 + $0x4] sm:$0xff]  ;;  %v459_v6 = vld [vmem:[%s717_s5 + $0x14] sm:$0xff] }
  0x1d   : > { %p151_p13 = scmp.lt.s32.totalorder %s150_s14, 71  ;;  %v460_v5 = vld [vmem:[%s717_s5 + $0x24] sm:$0xff]  ;;  %v469_v7 = vld [vmem:[%s717_s5 + $0x34] sm:$0xff] }
  0x1e   : > { %v491_v9 = vld [vmem:[%s717_s5 + $0x18] sm:$0xff]  ;;  %v484_v10 = vld [vmem:[%s717_s5 + $0x28] sm:$0xff] }
  0x1f   : > { %s867_s14 = smov (!%p151_p13, %s150_s14), 71  ;;  %v485_v11 = vld [vmem:[%s717_s5 + $0x38] sm:$0xff] }
  0x20   : > { %s441_s15 = sshll.u32 %s867_s14, 3 }
  0x21   : > { %s747_s17 = scalar_lea.vmem %s856_s1, %s441_s15 }
  0x22   : > { %454 = vst.msk [vmem:[%s747_s17 + $0x60] sm:$0xff] %vm163_vm0, %v466_v4 }
  0x23   : > { %182 = vrot.lane.b32.xlu1 %v171_v2, %s644_s6  ;;  %455 = vst.msk [vmem:[%s747_s17 + $0x68] sm:$0xff] %vm163_vm0, %v459_v6 }
  0x24   : > { %178 = vrot.lane.b32.xlu0 %v169_v3, %s644_s6  ;;  %203 = vrot.lane.b32.xlu2 %v169_v3, %s645_s12  ;;  %456 = vst.msk [vmem:[%s747_s17 + $0x70] sm:$0xff] %vm163_vm0, %v460_v5 }
  0x25   : > { %457 = vst.msk [vmem:[%s747_s17 + $0x78] sm:$0xff] %vm163_vm0, %v469_v7 }
  0x26   : > { %478 = vst.msk [vmem:[%s747_s17 + $0xc0] sm:$0xff] %vm163_vm0, %v482_v8 }
  0x27   : > { %479 = vst.msk [vmem:[%s747_s17 + $0xc8] sm:$0xff] %vm163_vm0, %v491_v9 }
  0x28   : > { %480 = vst.msk [vmem:[%s747_s17 + $0xd0] sm:$0xff] %vm163_vm0, %v484_v10 }
  0x29   : > { %481 = vst.msk [vmem:[%s747_s17 + $0xd8] sm:$0xff] %vm163_vm0, %v485_v11 }
  0x2a   : > { %164 = vst.msk [vmem:[%s747_s17] sm:$0xff] %vm163_vm0, %v168_v1 }
  0x2b   : > { %207 = vrot.lane.b32.xlu1 %v171_v2, %s645_s12  ;;  %165 = vst.msk [vmem:[%s747_s17 + $0x8] sm:$0xff] %vm163_vm0, %v169_v3 }
  0x2c   : > { %205 = vrot.lane.b32.xlu0 %v170_v0, %s645_s12  ;;  %239 = vrot.lane.b32.xlu2 %v466_v4, %s644_s6  ;;  %166 = vst.msk [vmem:[%s747_s17 + $0x10] sm:$0xff] %vm163_vm0, %v170_v0 }
  0x2d   : > { %167 = vst.msk [vmem:[%s747_s17 + $0x18] sm:$0xff] %vm163_vm0, %v171_v2 }
  0x33   : > { %243 = vrot.lane.b32.xlu1 %v460_v5, %s644_s6 }
  0x34   : > { %241 = vrot.lane.b32.xlu0 %v459_v6, %s644_s6  ;;  %245 = vrot.lane.b32.xlu2 %v469_v7, %s644_s6 }
  0x3b   : > { %266 = vrot.lane.b32.xlu1 %v459_v6, %s645_s12 }
  0x3c   : > { %264 = vrot.lane.b32.xlu0 %v466_v4, %s645_s12  ;;  %268 = vrot.lane.b32.xlu2 %v460_v5, %s645_s12 }
  0x43   : > { %301 = vrot.lane.b32.xlu1 %v482_v8, %s644_s6 }
  0x44   : > { %270 = vrot.lane.b32.xlu0 %v469_v7, %s645_s12  ;;  %303 = vrot.lane.b32.xlu2 %v491_v9, %s644_s6 }
  0x4b   : > { %307 = vrot.lane.b32.xlu1 %v485_v11, %s644_s6 }
  0x4c   : > { %305 = vrot.lane.b32.xlu0 %v484_v10, %s644_s6  ;;  %326 = vrot.lane.b32.xlu2 %v482_v8, %s645_s12 }
  0x53   : > { %330 = vrot.lane.b32.xlu1 %v484_v10, %s645_s12 }
  0x54   : > { %328 = vrot.lane.b32.xlu0 %v491_v9, %s645_s12  ;;  %332 = vrot.lane.b32.xlu2 %v485_v11, %s645_s12 }
  0x76   : > { %v202_v12 = vpop.permute.xlu2 %201 }
  0x77   : > { %446 = vst.msk [vmem:[%s747_s17 + $0x40] sm:$0xff] %vm163_vm0, %v202_v12 }
  0x7e   : > { %v204_v13 = vpop.permute.xlu2 %203 }
  0x7f   : > { %447 = vst.msk [vmem:[%s747_s17 + $0x48] sm:$0xff] %vm163_vm0, %v204_v13 }
  0x86   : > { %v240_v14 = vpop.permute.xlu2 %239 }
  0x87   : > { %462 = vst.msk [vmem:[%s747_s17 + $0x80] sm:$0xff] %vm163_vm0, %v240_v14 }
  0x8d   : > { %v181_v15 = vpop.permute.xlu1 %180 }
  0x8e   : > { %v177_v16 = vpop.permute.xlu0 %176  ;;  %444 = vst.msk [vmem:[%s747_s17 + $0x30] sm:$0xff] %vm163_vm0, %v181_v15  ;;  %v246_v17 = vpop.permute.xlu2 %245 }
  0x8f   : > { %442 = vst.msk [vmem:[%s747_s17 + $0x20] sm:$0xff] %vm163_vm0, %v177_v16 }
  0x90   : > { %465 = vst.msk [vmem:[%s747_s17 + $0x98] sm:$0xff] %vm163_vm0, %v246_v17 }
  0x95   : > { %v183_v18 = vpop.permute.xlu1 %182 }
  0x96   : > { %v179_v19 = vpop.permute.xlu0 %178  ;;  %445 = vst.msk [vmem:[%s747_s17 + $0x38] sm:$0xff] %vm163_vm0, %v183_v18  ;;  %v269_v20 = vpop.permute.xlu2 %268 }
  0x97   : > { %443 = vst.msk [vmem:[%s747_s17 + $0x28] sm:$0xff] %vm163_vm0, %v179_v19 }
  0x98   : > { %472 = vst.msk [vmem:[%s747_s17 + $0xb0] sm:$0xff] %vm163_vm0, %v269_v20 }
  0x9d   : > { %v208_v21 = vpop.permute.xlu1 %207 }
  0x9e   : > { %v206_v22 = vpop.permute.xlu0 %205  ;;  %449 = vst.msk [vmem:[%s747_s17 + $0x58] sm:$0xff] %vm163_vm0, %v208_v21  ;;  %v304_v23 = vpop.permute.xlu2 %303 }
  0x9f   : > { %448 = vst.msk [vmem:[%s747_s17 + $0x50] sm:$0xff] %vm163_vm0, %v206_v22 }
  0xa0   : > { %487 = vst.msk [vmem:[%s747_s17 + $0xe8] sm:$0xff] %vm163_vm0, %v304_v23 }
  0xa5   : > { %v244_v24 = vpop.permute.xlu1 %243 }
  0xa6   : > { %v242_v25 = vpop.permute.xlu0 %241  ;;  %464 = vst.msk [vmem:[%s747_s17 + $0x90] sm:$0xff] %vm163_vm0, %v244_v24  ;;  %v327_v26 = vpop.permute.xlu2 %326 }
  0xa7   : > { %463 = vst.msk [vmem:[%s747_s17 + $0x88] sm:$0xff] %vm163_vm0, %v242_v25 }
  0xa8   : > { %494 = vst.msk [vmem:[%s747_s17 + $0x100] sm:$0xff] %vm163_vm0, %v327_v26 }
  0xad   : > { %v267_v27 = vpop.permute.xlu1 %266 }
  0xae   : > { %v265_v28 = vpop.permute.xlu0 %264  ;;  %471 = vst.msk [vmem:[%s747_s17 + $0xa8] sm:$0xff] %vm163_vm0, %v267_v27  ;;  %v333_v29 = vpop.permute.xlu2 %332 }
  0xaf   : > { %470 = vst.msk [vmem:[%s747_s17 + $0xa0] sm:$0xff] %vm163_vm0, %v265_v28 }
  0xb0   : > { %497 = vst.msk [vmem:[%s747_s17 + $0x118] sm:$0xff] %vm163_vm0, %v333_v29 }
  0xb5   : > { %v302_v30 = vpop.permute.xlu1 %301 }
  0xb6   : > { %v271_v31 = vpop.permute.xlu0 %270  ;;  %486 = vst.msk [vmem:[%s747_s17 + $0xe0] sm:$0xff] %vm163_vm0, %v302_v30 }
  0xb7   : > { %473 = vst.msk [vmem:[%s747_s17 + $0xb8] sm:$0xff] %vm163_vm0, %v271_v31 }
  0xbd   : > { %v308_v32 = vpop.permute.xlu1 %307 }
  0xbe   : > { %v306_v33 = vpop.permute.xlu0 %305  ;;  %489 = vst.msk [vmem:[%s747_s17 + $0xf8] sm:$0xff] %vm163_vm0, %v308_v32 }
  0xbf   : > { %488 = vst.msk [vmem:[%s747_s17 + $0xf0] sm:$0xff] %vm163_vm0, %v306_v33 }
  0xc5   : > { %v331_v34 = vpop.permute.xlu1 %330 }
  0xc6   : > { %v329_v35 = vpop.permute.xlu0 %328  ;;  %496 = vst.msk [vmem:[%s747_s17 + $0x110] sm:$0xff] %vm163_vm0, %v331_v34 }
  0xc7   : > { %495 = vst.msk [vmem:[%s747_s17 + $0x108] sm:$0xff] %vm163_vm0, %v329_v35 }
  0xc8 PF: > { %s14_s11 = sadd.s32 1, %s640_s11   ;;  %s859_s6 = smov %s624_s7 }
  0xc9   : > { %p11_p0 = scmp.ge.s32.totalorder %s14_s11, 4   ;;  %s860_s7 = smov %s628_s8 }
  0xca   : > { %s861_s8 = smov %s705_s18  ;;  %s862_s9 = smov %s636_s10 }
  0xcb   : > { %s863_s10 = smov %s865_s13  ;;  %13 = sbr.rel (!%p11_p0) target bundleno = 4 (0x4), region = 75 }
  0xd0   :  { %368 = vsyncpa [#allocation3], 1 }
  0xd1   :  { %370 = vsyncpa [#allocation3 + $0x1], 1 }

</bundles_post_ra>
